<compile_context>
chip_gen: v7x
topology: tpu7x:2x2x1
jax: 0.10.0
libtpu: 0.0.40
codegen_flags: <defaults>
</compile_context>

<pallas_src>
import jax
import jax.numpy as jnp
from jax.experimental import pallas as pl
from jax.experimental.pallas import tpu as pltpu


def _homography_fwd_kernel(h_ref, o_ref):
    # h_ref / o_ref: (1, 3, 3) VMEM tiles; single invocation, trivial copy.
    o_ref[...] = h_ref[...]


@jax.jit
def homography_forward(homography: jax.Array) -> jax.Array:
    """Pallas equivalent of Homography.forward(): returns (1, 3, 3).

    Note: in a real pipeline the right call is just `homography[None]`
    (metadata-only); the pallas_call below exists purely to exercise the
    kernel plumbing with minimal overhead.
    """
    assert homography.shape == (3, 3)
    # Unsqueeze in the wrapper — metadata-only reshape under jit.
    h = jnp.reshape(homography, (1, 3, 3))
    return pl.pallas_call(
        _homography_fwd_kernel,
        out_shape=jax.ShapeDtypeStruct((1, 3, 3), homography.dtype),
        # No grid: block_shape defaults to the full array, single invocation.
        in_specs=[pl.BlockSpec(memory_space=pltpu.MemorySpace.VMEM)],
        out_specs=pl.BlockSpec(memory_space=pltpu.MemorySpace.VMEM),
    )(h)


def init_homography_param() -> jax.Array:
    """Deterministic init matching torch.nn.init.eye_ on a (3, 3) parameter."""
    return jnp.eye(3, dtype=jnp.float32)


if __name__ == "__main__":
    key = jax.random.PRNGKey(0)

    # 1) Module-faithful case: identity-initialized parameter.
    homography_param = init_homography_param()
    out = jax.block_until_ready(homography_forward(homography_param))

    ref = jnp.expand_dims(homography_param, axis=0)
    assert out.shape == (1, 3, 3), out.shape
    assert out.dtype == jnp.float32, out.dtype
    assert bool(jnp.array_equal(out, ref)), "Pallas output mismatch vs reference"

    # 2) Sanity check with a non-identity (3, 3) parameter (deterministic).
    rand_param = jax.random.normal(key, (3, 3), dtype=jnp.float32)
    out2 = jax.block_until_ready(homography_forward(rand_param))
    ref2 = jnp.expand_dims(rand_param, axis=0)
    assert bool(jnp.array_equal(out2, ref2)), "Pallas output mismatch (random param)"

    print("KERNEL_OK")
</pallas_src>

<mosaic_0001>
module attributes {stable_mosaic.version = 11 : i64} {
  func.func @_homography_fwd_kernel(%arg0: memref<1x3x3xf32, #tpu.memory_space<vmem>>, %arg1: memref<1x3x3xf32, #tpu.memory_space<vmem>>) attributes {dimension_semantics = [], scalar_prefetch = 0 : i64, scratch_operands = 0 : i64, tpu.core_type = #tpu.core_type<tc>} {
    %c0 = arith.constant 0 : index
    %c0_0 = arith.constant 0 : index
    %c0_1 = arith.constant 0 : index
    %0 = vector.load %arg0[%c0, %c0_0, %c0_1] : memref<1x3x3xf32, #tpu.memory_space<vmem>>, vector<1x3x3xf32>
    %c0_2 = arith.constant 0 : index
    %c0_3 = arith.constant 0 : index
    %c0_4 = arith.constant 0 : index
    %1 = vector.load %arg1[%c0_2, %c0_3, %c0_4] : memref<1x3x3xf32, #tpu.memory_space<vmem>>, vector<1x3x3xf32>
    tpu.vector_store %arg1[%c0_2, %c0_3, %c0_4], %0 {strides = array<i32>} : memref<1x3x3xf32, #tpu.memory_space<vmem>>, vector<1x3x3xf32>,
    return
  }
}

</mosaic_0001>

<bundles_post_ra>
// kernel: homography_forward.1
= control target key start
LH: loop header
LB: loop body
LE: loop exit
PB: predicated region body
PF: predicated region fallthrough
CT: control target
= control target key end

     0   :  { %6 = vsyncpa [#allocation3], 0  ;;  %s53_s6 = smov [#allocation2]   ;;  %s79_s0 = inlined_call_operand.hbm [shape: f32[1,3,3], index: 0, kind: input, shape index: {}]   ;;  %s80_s1 = inlined_call_operand.vmem [shape: f32[1,3,3], index: 1, kind: output, shape index: {}]  }
   0x1   :  { %s13_s7 = sshll.u32 %s53_s6, 4  ;;  %s29_s10 = scalar_lea.hbm %s79_s0, 64  ;;  %s14_s7 = int_to_ptr.vmem [resolvable:$true] %s13_s7 }
   0x2   :  { %p30_p0 = scmp.ne.s32.totalorder %s79_s0, %s29_s10  ;;  %p33_p1 = scmp.lt.u32.totalorder %s29_s10, %s79_s0 }
   0x4   :  { %p35_p2 = pnand %p33_p1, %p30_p0 }
   0x6   :  { %38 = shalt.err (!%p35_p2)
}
   0x7   :  { %s39_s15 = scalar_lea.vmem %s14_s7, 64  ;;  %p44_p4 = scmp.lt.s32.totalorder %s14_s7, %s14_s7 }
   0x8   :  { %p40_p3 = scmp.ne.s32.totalorder %s14_s7, %s39_s15  ;;  %p45_p5 = scmp.lt.s32.totalorder %s39_s15, %s39_s15 }
   0xa   :  { %p46_p6 = por %p45_p5, %p44_p4 }
   0xc   :  { %p47_p7 = pnand %p46_p6, %p40_p3 }
   0xe   :  { %50 = shalt.err (!%p47_p7)
}
   0xf   :  { %16 = dma.hbm_to_vmem [thread:$0]  %s79_s0, 64, %s14_s7, [#allocation3]  }
  0x10   :  { %51 = dma.done.wait [#allocation3], 64  }
  0x11   :  { %52 = vsyncadd [#allocation3], 4294967232  ;;  %vm21_vm0 = vcmask 18432   ;;  %v20_v0 = vld [vmem:[#allocation2] sm:$0x7] }
  0x12   :  { %22 = vst.msk [vmem:[%s80_s1] sm:$0x7] %vm21_vm0, %v20_v0 }
  0x13   :  { %27 = vsyncpa [#allocation3], 1 }

</bundles_post_ra>
